<compile_context>
chip_gen: v5e
topology: v5e:2x2
jax: 0.10.0
libtpu: 0.0.40
codegen_flags: <defaults>
</compile_context>

<pallas_src>
import math

import numpy as np
import jax
import jax.numpy as jnp
from jax import lax
from jax.experimental import pallas as pl
from jax.experimental.pallas import tpu as pltpu


def _motion_kernel(h_ref, a1_ref, b1_ref, m2_ref, b2_ref, pool_ref, o_ref):
    """One batch block.  h block is (C, W, Mf) with Mf = NB*F (multiple of 128)."""
    x = h_ref[...]                                          # (C, W, Mf)
    _, W, Mf = x.shape

    # torch.argmax over W (first occurrence).  W sits on the sublane axis, so
    # the max / compare / min chain runs on fully populated 128-lane vregs.
    iota = lax.broadcasted_iota(jnp.int32, x.shape, 1)
    mx = jnp.max(x, axis=1, keepdims=True)
    idx = jnp.min(jnp.where(x == mx, iota, W), axis=1)      # (C, Mf) int32
    idx = idx.astype(jnp.float32)

    # Frame-to-frame difference along the packed (batch, frame) lane axis:
    # rotate-left-by-one (== roll by Mf-1) on the XLU, then subtract.  The seam
    # columns (frame F-1 of each sample, which pick up the next sample's frame
    # 0 / the wrap-around) carry garbage and are simply dropped host-side, so
    # no masking, packing loop or scratch buffer is needed.
    d = pltpu.roll(idx, Mf - 1, 1) - idx                    # (C, Mf)

    # Linear(2->E) + conv1 + BN1 folded into one matmul, then tanh.
    y1 = jnp.tanh(jnp.dot(a1_ref[...], d,
                          preferred_element_type=jnp.float32) + b1_ref[...])
    # conv2 + BN2 folded into one matmul, then tanh.
    y2 = jnp.tanh(jnp.dot(m2_ref[...], y1,
                          preferred_element_type=jnp.float32) + b2_ref[...])
    # AvgPool2d((1,5), stride 1) as a pooling matmul; lane-dense store.
    o_ref[...] = jnp.dot(pool_ref[...], y2, preferred_element_type=jnp.float32)


def _conv1x3_s2_matrix(w, win):
    """Lower Conv2d(kernel=(1,3), stride=(1,2), pad=(0,1), bias=False) weights
    (Cout, Cin, 1, 3) to a dense (Cin*Win, Cout*Wout) matmul matrix."""
    w = np.asarray(w, dtype=np.float64)
    cout, cin, _, kk = w.shape
    wout = (win + 2 - kk) // 2 + 1
    m = np.zeros((cin * win, cout * wout), np.float64)
    for co in range(cout):
        for ci in range(cin):
            for k in range(kk):
                for wo in range(wout):
                    p = 2 * wo + k - 1
                    if 0 <= p < win:
                        m[ci * win + p, co * wout + wo] = w[co, ci, 0, k]
    return m, wout


def motion_extractor_max(h, wup, bup, conv1_w, scale1, bias1,
                         conv2_w, scale2, bias2):
    N, C, F, W = h.shape
    E = wup.shape[1]
    P1 = conv1_w.shape[0]
    P2 = conv2_w.shape[0]

    # ---------------- host-side folding (exact, in float64) ----------------
    m1, w1out = _conv1x3_s2_matrix(conv1_w, E)               # (C*E, P1*w1out)
    m2, w2out = _conv1x3_s2_matrix(conv2_w, w1out)           # (P1*w1out, P2*w2out)

    wup_np = np.asarray(wup, np.float64)
    bup_np = np.asarray(bup, np.float64)
    s1 = np.repeat(np.asarray(scale1, np.float64), w1out)    # (P1*w1out,)
    b1 = np.repeat(np.asarray(bias1, np.float64), w1out)
    s2 = np.repeat(np.asarray(scale2, np.float64), w2out)    # (P2*w2out,)
    b2 = np.repeat(np.asarray(bias2, np.float64), w2out)

    # Fold Linear(2->E) into conv1: row = idx/W, col = idx  =>  up = d*weff + bup
    weff = wup_np[0] / float(W) + wup_np[1]                  # (E,)
    m1r = m1.reshape(C, E, P1 * w1out)
    a1 = np.einsum('e,ceo->co', weff, m1r)                   # (C, P1*w1out)
    k1 = np.einsum('e,ceo->o', bup_np, m1r)                  # (P1*w1out,)

    a1s_t = (a1 * s1[None, :]).T.astype(np.float32)          # (D1, C)
    b1e = (k1 * s1 + b1)[:, None].astype(np.float32)         # (D1, 1)
    m2s_t = (m2 * s2[None, :]).T.astype(np.float32)          # (D2, D1)
    b2e = b2[:, None].astype(np.float32)                     # (D2, 1)

    # AvgPool2d((1,5), stride 1) as a matrix; rows padded to a sublane multiple.
    pool_k = 5
    wpool = w2out - pool_k + 1
    assert wpool >= 1
    P2w = P2 * wpool
    P2w_pad = ((P2w + 7) // 8) * 8
    pool_t = np.zeros((P2w_pad, P2 * w2out), np.float32)
    for p in range(P2):
        for wo in range(wpool):
            pool_t[p * wpool + wo,
                   p * w2out + wo: p * w2out + wo + pool_k] = 1.0 / pool_k

    # ---------------- batch blocking ----------------
    # M = NB*F matmul/store columns per grid step.  NB is a multiple of q so M
    # is always a multiple of 128 (lane-dense stores + full MXU tiles),
    # targeting M ~ 1024; we only split the grid (megacore-parallel on v7x)
    # when every step keeps >= 512 columns, and prefer NB | N to avoid padding.
    q = 128 // math.gcd(F, 128)
    bytes_per_batch = C * F * W * h.dtype.itemsize
    nb_vmem = max(q, ((8 * 1024 * 1024) // max(bytes_per_batch, 1)) // q * q)
    nb_cap = max(q, (1024 // max(F, 1)) // q * q)
    nb_cap = min(nb_cap, nb_vmem)
    if N <= nb_cap:
        NB = ((N + q - 1) // q) * q          # single grid step
    else:
        NB = nb_cap
        min_nb = max(q, ((-(-512 // F)) + q - 1) // q * q)
        for cand in range(NB, min_nb - 1, -q):
            if N % cand == 0:                # avoid zero-padding h for large N
                NB = cand
                break
    grid_b = max(1, (N + NB - 1) // NB)
    Npad = grid_b * NB
    Mf = NB * F

    # ---- relayout h to (C, W, Npad*F): W on sublanes, packed (n, f) on lanes ----
    h_t = jnp.transpose(h, (1, 3, 0, 2))                     # (C, W, N, F)
    if Npad != N:
        h_t = jnp.pad(h_t, ((0, 0), (0, 0), (0, Npad - N), (0, 0)))
    h_t = h_t.reshape(C, W, Npad * F)

    D1 = P1 * w1out
    D2 = P2 * w2out
    full2 = lambda n: (0, 0)

    out = pl.pallas_call(
        _motion_kernel,
        out_shape=jax.ShapeDtypeStruct((grid_b * P2w_pad, Mf), jnp.float32),
        grid=(grid_b,),
        in_specs=[
            pl.BlockSpec((C, W, Mf), lambda n: (0, 0, n)),
            pl.BlockSpec((D1, C), full2),
            pl.BlockSpec((D1, 1), full2),
            pl.BlockSpec((D2, D1), full2),
            pl.BlockSpec((D2, 1), full2),
            pl.BlockSpec((P2w_pad, D2), full2),
        ],
        out_specs=pl.BlockSpec((P2w_pad, Mf), lambda n: (n, 0)),
        compiler_params=pltpu.CompilerParams(
            dimension_semantics=("parallel",)),
    )(h_t, jnp.asarray(a1s_t), jnp.asarray(b1e), jnp.asarray(m2s_t),
      jnp.asarray(b2e), jnp.asarray(pool_t))

    # (grid_b*P2w_pad, NB*F) -> (N, P2, F-1, wpool): drop padded rows, padded
    # batches and the per-sample seam column (frame F-1).
    out = out.reshape(grid_b, P2w_pad, NB, F)[:, :P2w]
    out = out.reshape(grid_b, P2, wpool, NB, F)
    out = out.transpose(0, 3, 1, 4, 2).reshape(Npad, P2, F, wpool)
    return out[:N, :, :F - 1, :]


def reference(h, wup, bup, conv1_w, scale1, bias1, conv2_w, scale2, bias2):
    """Pure-JAX reference mirroring the PyTorch forward (eval-mode BN)."""
    N, C, F, W = h.shape
    idx = jnp.argmax(h, axis=-1)
    row = idx.astype(jnp.float32) / W
    col = (idx % W).astype(jnp.float32)
    ind = jnp.stack([row, col], axis=-1)                     # (N, C, F, 2)
    motion = ind[:, :, 1:, :] - ind[:, :, :-1, :]            # (N, C, F-1, 2)
    up = motion @ wup + bup                                  # (N, C, F-1, E)

    def block(x, w, s, b):
        y = lax.conv_general_dilated(x, w, window_strides=(1, 2),
                                     padding=((0, 0), (1, 1)),
                                     dimension_numbers=("NCHW", "OIHW", "NCHW"))
        return jnp.tanh(y * s[None, :, None, None] + b[None, :, None, None])

    y = block(up, conv1_w, scale1, bias1)
    y = block(y, conv2_w, scale2, bias2)
    k = 5
    wpool = y.shape[-1] - k + 1
    return sum(y[..., i:i + wpool] for i in range(k)) / float(k)


if __name__ == "__main__":
    # Small shapes consistent with the module: inplanes=C=4, iterplanes=8,
    # outplanes=16, num_embedding=20.
    N, C, F, W = 2, 4, 8, 16
    iterplanes, outplanes, E = 8, 16, 20
    eps = 1e-5

    ks = jax.random.split(jax.random.PRNGKey(0), 13)
    h = jax.random.normal(ks[0], (N, C, F, W), jnp.float32)

    wup = 0.1 * jax.random.normal(ks[1], (2, E), jnp.float32)   # Linear weight^T
    bup = 0.1 * jax.random.normal(ks[2], (E,), jnp.float32)
    w1 = 0.1 * jax.random.normal(ks[3], (iterplanes, C, 1, 3), jnp.float32)
    w2 = 0.1 * jax.random.normal(ks[4], (outplanes, iterplanes, 1, 3), jnp.float32)

    g1 = 1.0 + 0.1 * jax.random.normal(ks[5], (iterplanes,), jnp.float32)
    be1 = 0.1 * jax.random.normal(ks[6], (iterplanes,), jnp.float32)
    rm1 = 0.1 * jax.random.normal(ks[7], (iterplanes,), jnp.float32)
    rv1 = 0.5 + jax.random.uniform(ks[8], (iterplanes,), jnp.float32)
    g2 = 1.0 + 0.1 * jax.random.normal(ks[9], (outplanes,), jnp.float32)
    be2 = 0.1 * jax.random.normal(ks[10], (outplanes,), jnp.float32)
    rm2 = 0.1 * jax.random.normal(ks[11], (outplanes,), jnp.float32)
    rv2 = 0.5 + jax.random.uniform(ks[12], (outplanes,), jnp.float32)

    scale1 = g1 / jnp.sqrt(rv1 + eps)
    bias1 = be1 - rm1 * scale1
    scale2 = g2 / jnp.sqrt(rv2 + eps)
    bias2 = be2 - rm2 * scale2

    out = motion_extractor_max(h, wup, bup, w1, scale1, bias1, w2, scale2, bias2)
    out = jax.block_until_ready(out)

    ref = reference(h, wup, bup, w1, scale1, bias1, w2, scale2, bias2)
    np.testing.assert_allclose(np.asarray(out), np.asarray(ref),
                               atol=1e-2, rtol=1e-2)
    assert out.shape == (N, outplanes, F - 1, 1)
    print("KERNEL_OK")
</pallas_src>

<mosaic_0001>
module attributes {stable_mosaic.version = 11 : i64} {
  func.func @_motion_kernel(%arg0: i32, %arg1: memref<4x16x128xf32, #tpu.memory_space<vmem>>, %arg2: memref<80x4xf32, #tpu.memory_space<vmem>>, %arg3: memref<80x1xf32, #tpu.memory_space<vmem>>, %arg4: memref<80x80xf32, #tpu.memory_space<vmem>>, %arg5: memref<80x1xf32, #tpu.memory_space<vmem>>, %arg6: memref<16x80xf32, #tpu.memory_space<vmem>>, %arg7: memref<16x128xf32, #tpu.memory_space<vmem>>) attributes {dimension_semantics = [#tpu.dimension_semantics<parallel>], iteration_bounds = array<i64: 1>, scalar_prefetch = 0 : i64, scratch_operands = 0 : i64, tpu.core_type = #tpu.core_type<tc>, window_params = [{transform_indices = @transform_0, window_bounds = array<i64: 4, 16, 128>}, {pipeline_mode = #tpu.pipeline_mode<synchronous>, transform_indices = @transform_1, window_bounds = array<i64: 80, 4>}, {pipeline_mode = #tpu.pipeline_mode<synchronous>, transform_indices = @transform_2, window_bounds = array<i64: 80, 1>}, {pipeline_mode = #tpu.pipeline_mode<synchronous>, transform_indices = @transform_3, window_bounds = array<i64: 80, 80>}, {pipeline_mode = #tpu.pipeline_mode<synchronous>, transform_indices = @transform_4, window_bounds = array<i64: 80, 1>}, {pipeline_mode = #tpu.pipeline_mode<synchronous>, transform_indices = @transform_5, window_bounds = array<i64: 16, 80>}, {transform_indices = @transform_6, window_bounds = array<i64: 16, 128>}]} {
    %c0 = arith.constant 0 : index
    %c0_0 = arith.constant 0 : index
    %c0_1 = arith.constant 0 : index
    %0 = vector.load %arg1[%c0, %c0_0, %c0_1] : memref<4x16x128xf32, #tpu.memory_space<vmem>>, vector<4x16x128xf32>
    %1 = tpu.iota {dimensions = array<i32: 1>} : vector<4x16x128xi32>
    %cst = arith.constant dense<0xFF800000> : vector<4x128xf32>
    %2 = vector.multi_reduction <maximumf>, %0, %cst [1] : vector<4x16x128xf32> to vector<4x128xf32>
    %3 = vector.shape_cast %2 : vector<4x128xf32> to vector<4x1x128xf32>
    %4 = vector.broadcast %3 : vector<4x1x128xf32> to vector<4x16x128xf32>
    %5 = arith.cmpf oeq, %0, %4 : vector<4x16x128xf32>
    %c16_i32 = arith.constant 16 : i32
    %6 = vector.broadcast %c16_i32 : i32 to vector<4x16x128xi32>
    %7 = arith.select %5, %1, %6 : vector<4x16x128xi1>, vector<4x16x128xi32>
    %cst_2 = arith.constant dense<2147483647> : vector<4x128xi32>
    %8 = vector.multi_reduction <minsi>, %7, %cst_2 [1] : vector<4x16x128xi32> to vector<4x128xi32>
    %9 = arith.sitofp %8 : vector<4x128xi32> to vector<4x128xf32>
    %c127_i32 = arith.constant 127 : i32
    %10 = tpu.dynamic_rotate %9 by %c127_i32 dim 1 : vector<4x128xf32>, i32 -> vector<4x128xf32>
    %11 = arith.subf %10, %9 : vector<4x128xf32>
    %c0_3 = arith.constant 0 : index
    %c0_4 = arith.constant 0 : index
    %12 = vector.load %arg2[%c0_3, %c0_4] : memref<80x4xf32, #tpu.memory_space<vmem>>, vector<80x4xf32>
    %cst_5 = arith.constant dense<0.000000e+00> : vector<80x128xf32>
    %13 = tpu.matmul %12, %11, %cst_5 {dimension_numbers = #tpu.dot_dimension_numbers<[1], [0], [0], [1], [0, 0, 1, 1], [], []>} : vector<80x4xf32>, vector<4x128xf32>, vector<80x128xf32> -> vector<80x128xf32>
    %c0_6 = arith.constant 0 : index
    %c0_7 = arith.constant 0 : index
    %14 = vector.load %arg3[%c0_6, %c0_7] : memref<80x1xf32, #tpu.memory_space<vmem>>, vector<80x1xf32>
    %15 = vector.broadcast %14 : vector<80x1xf32> to vector<80x128xf32>
    %16 = arith.addf %13, %15 : vector<80x128xf32>
    %17 = math.tanh %16 : vector<80x128xf32>
    %c0_8 = arith.constant 0 : index
    %c0_9 = arith.constant 0 : index
    %18 = vector.load %arg4[%c0_8, %c0_9] : memref<80x80xf32, #tpu.memory_space<vmem>>, vector<80x80xf32>
    %cst_10 = arith.constant dense<0.000000e+00> : vector<80x128xf32>
    %19 = tpu.matmul %18, %17, %cst_10 {dimension_numbers = #tpu.dot_dimension_numbers<[1], [0], [0], [1], [0, 0, 1, 1], [], []>} : vector<80x80xf32>, vector<80x128xf32>, vector<80x128xf32> -> vector<80x128xf32>
    %c0_11 = arith.constant 0 : index
    %c0_12 = arith.constant 0 : index
    %20 = vector.load %arg5[%c0_11, %c0_12] : memref<80x1xf32, #tpu.memory_space<vmem>>, vector<80x1xf32>
    %21 = vector.broadcast %20 : vector<80x1xf32> to vector<80x128xf32>
    %22 = arith.addf %19, %21 : vector<80x128xf32>
    %23 = math.tanh %22 : vector<80x128xf32>
    %c0_13 = arith.constant 0 : index
    %c0_14 = arith.constant 0 : index
    %24 = vector.load %arg6[%c0_13, %c0_14] : memref<16x80xf32, #tpu.memory_space<vmem>>, vector<16x80xf32>
    %cst_15 = arith.constant dense<0.000000e+00> : vector<16x128xf32>
    %25 = tpu.matmul %24, %23, %cst_15 {dimension_numbers = #tpu.dot_dimension_numbers<[1], [0], [0], [1], [0, 0, 1, 1], [], []>} : vector<16x80xf32>, vector<80x128xf32>, vector<16x128xf32> -> vector<16x128xf32>
    %c0_16 = arith.constant 0 : index
    %c0_17 = arith.constant 0 : index
    %26 = vector.load %arg7[%c0_16, %c0_17] : memref<16x128xf32, #tpu.memory_space<vmem>>, vector<16x128xf32>
    tpu.vector_store %arg7[%c0_16, %c0_17], %25 {strides = array<i32>} : memref<16x128xf32, #tpu.memory_space<vmem>>, vector<16x128xf32>,
    return
  }
  func.func @transform_0(%arg0: i32) -> (i32, i32, i32) {
    %c0_i32 = arith.constant 0 : i32
    %c0_i32_0 = arith.constant 0 : i32
    %c0_i32_1 = arith.constant 0 : i32
    return %c0_i32, %c0_i32_0, %arg0 : i32, i32, i32
  }
  func.func @transform_1(%arg0: i32) -> (i32, i32) {
    %c0_i32 = arith.constant 0 : i32
    %c0_i32_0 = arith.constant 0 : i32
    %c0_i32_1 = arith.constant 0 : i32
    return %c0_i32, %c0_i32_0 : i32, i32
  }
  func.func @transform_2(%arg0: i32) -> (i32, i32) {
    %c0_i32 = arith.constant 0 : i32
    %c0_i32_0 = arith.constant 0 : i32
    %c0_i32_1 = arith.constant 0 : i32
    return %c0_i32, %c0_i32_0 : i32, i32
  }
  func.func @transform_3(%arg0: i32) -> (i32, i32) {
    %c0_i32 = arith.constant 0 : i32
    %c0_i32_0 = arith.constant 0 : i32
    %c0_i32_1 = arith.constant 0 : i32
    return %c0_i32, %c0_i32_0 : i32, i32
  }
  func.func @transform_4(%arg0: i32) -> (i32, i32) {
    %c0_i32 = arith.constant 0 : i32
    %c0_i32_0 = arith.constant 0 : i32
    %c0_i32_1 = arith.constant 0 : i32
    return %c0_i32, %c0_i32_0 : i32, i32
  }
  func.func @transform_5(%arg0: i32) -> (i32, i32) {
    %c0_i32 = arith.constant 0 : i32
    %c0_i32_0 = arith.constant 0 : i32
    %c0_i32_1 = arith.constant 0 : i32
    return %c0_i32, %c0_i32_0 : i32, i32
  }
  func.func @transform_6(%arg0: i32) -> (i32, i32) {
    %c0_i32 = arith.constant 0 : i32
    %c0_i32_0 = arith.constant 0 : i32
    return %arg0, %c0_i32 : i32, i32
  }
}

</mosaic_0001>

<bundles_post_ra>
// kernel: tpu_custom_call.1
= control target key start
LH: loop header
LB: loop body
LE: loop exit
PB: predicated region body
PF: predicated region fallthrough
CT: control target
= control target key end

     0   :  { %s835_s0 = inlined_call_operand.vmem [shape: f32[4,16,128], index: 0, kind: input, shape index: {}]   ;;  %s836_s1 = inlined_call_operand.vmem [shape: f32[80,4], index: 1, kind: input, shape index: {}]   ;;  %s837_s2 = inlined_call_operand.vmem [shape: f32[80,1], index: 2, kind: input, shape index: {}]   ;;  %s838_s3 = inlined_call_operand.vmem [shape: f32[80,80], index: 3, kind: input, shape index: {}]   ;;  %s839_s4 = inlined_call_operand.vmem [shape: f32[80,1], index: 4, kind: input, shape index: {}]   ;;  %s840_s5 = inlined_call_operand.vmem [shape: f32[16,80], index: 5, kind: input, shape index: {}]   ;;  %s841_s6 = inlined_call_operand.hbm [shape: f32[16,128], index: 6, kind: output, shape index: {}]  }
   0x1   :  { %v24_v0 = vld [vmem:[%s835_s0] sm:$0xff]  ;;  %v25_v1 = vld [vmem:[%s835_s0 + $0x8] sm:$0xff]  ;;  %v26_v2 = vld [vmem:[%s835_s0 + $0x10] sm:$0xff] }
   0x2   :  { %v27_v3 = vld [vmem:[%s835_s0 + $0x18] sm:$0xff]  ;;  %v28_v4 = vld [vmem:[%s835_s0 + $0x20] sm:$0xff]  ;;  %v29_v5 = vld [vmem:[%s835_s0 + $0x28] sm:$0xff]  ;;  %v35_v6 = vmax.f32 %v24_v0, %v25_v1 }
   0x3   :  { %v30_v7 = vld [vmem:[%s835_s0 + $0x30] sm:$0xff]  ;;  %v31_v8 = vld [vmem:[%s835_s0 + $0x38] sm:$0xff]  ;;  %v42_v9 = vmax.f32 %v26_v2, %v27_v3  ;;  %v49_v10 = vmax.f32 %v28_v4, %v29_v5 }
   0x4   :  { %11 = vsyncpa [#allocation3], 0  ;;  %v36_v11 = vrot.slane %v35_v6, 4  ;;  %v56_v12 = vmax.f32 %v30_v7, %v31_v8  ;;  %v32_v15 = vlaneseq  ;;  %v159_v20 = vld [vmem:[%s837_s2 + $0x40] sm:$0xff]  ;;  %v620_v23 = vmov 0   ;;  %s621_s0 = smov 127  }
   0x5   :  { %v43_v13 = vrot.slane %v42_v9, 4  ;;  %v50_v14 = vrot.slane %v49_v10, 4  ;;  %552 = vset.pattern.permute.xlu1 %v620_v23  ;;  %553 = vset.pattern.permute.xlu2 %v620_v23  ;;  %s622_s17 = smov [#allocation2]   ;;  %s500_s21 = sshll.u32 %s841_s6, 4  ;;  %s501_s21 = int_to_ptr.hbm [resolvable:$true] %s500_s21 }
   0x6   :  { %v37_v16 = vmax.f32 %v35_v6, %v36_v11  ;;  %v57_v17 = vrot.slane %v56_v12, 4  ;;  %203 = vperm.xlu1 %552, %v159_v20   ;;  %551 = vset.pattern.permute.xlu0 %v620_v23  ;;  %v33_v26 = vshrl.u32 %v32_v15, 7  ;;  %v158_v20 = vld [vmem:[%s837_s2 + $0x38] sm:$0xff]  ;;  %v160_v23 = vld [vmem:[%s837_s2 + $0x48] sm:$0xff]  ;;  %s498_s18 = sshll.u32 %s622_s17, 4  ;;  %s499_s18 = int_to_ptr.vmem [resolvable:$true] %s498_s18 }
   0x7   :  { %v44_v18 = vmax.f32 %v42_v9, %v43_v13  ;;  %v51_v19 = vmax.f32 %v49_v10, %v50_v14 }
   0x8   :  { %v38_v21 = vrot.slane %v37_v16, 2  ;;  %v58_v22 = vmax.f32 %v56_v12, %v57_v17  ;;  %v34_v35 = vadd.s32 8, %v33_v26 }
   0x9   :  { %v45_v24 = vrot.slane %v44_v18, 2  ;;  %v52_v25 = vrot.slane %v51_v19, 2 }
   0xa   :  { %v39_v27 = vmax.f32 %v37_v16, %v38_v21  ;;  %v59_v28 = vrot.slane %v58_v22, 2  ;;  %v157_v21 = vld [vmem:[%s837_s2 + $0x30] sm:$0xff] }
   0xb   :  { %v46_v29 = vmax.f32 %v44_v18, %v45_v24  ;;  %v53_v30 = vmax.f32 %v51_v19, %v52_v25  ;;  %193 = vperm.xlu2 %553, %v157_v21   ;;  %v156_v24 = vld [vmem:[%s837_s2 + $0x28] sm:$0xff] }
   0xc   :  { %v40_v31 = vrot.slane %v39_v27, 1  ;;  %v60_v32 = vmax.f32 %v58_v22, %v59_v28  ;;  %v155_v22 = vld [vmem:[%s837_s2 + $0x20] sm:$0xff]  ;;  %v152_v25 = vld [vmem:[%s837_s2 + $0x8] sm:$0xff] }
   0xd   :  { %v47_v33 = vrot.slane %v46_v29, 1  ;;  %v54_v34 = vrot.slane %v53_v30, 1  ;;  %v321_v28 = vld [vmem:[%s839_s4 + $0x40] sm:$0xff] }
   0xe   :  { %v41_v36 = vmax.f32 %v39_v27, %v40_v31  ;;  %v61_v37 = vrot.slane %v60_v32, 1  ;;  %198 = vperm.xlu1 %552, %v158_v20   ;;  %v154_v27 = vld [vmem:[%s837_s2 + $0x18] sm:$0xff] }
   0xf   :  { %v48_v38 = vmax.f32 %v46_v29, %v47_v33  ;;  %v55_v39 = vmax.f32 %v53_v30, %v54_v34  ;;  %v322_v29 = vld [vmem:[%s839_s4 + $0x48] sm:$0xff]  ;;  %v148_v33 = vld [vmem:[%s836_s1 + $0x38] sm:$0xff]  ;;  %v151_v34 = vld [vmem:[%s837_s2] sm:$0xff] }
  0x10   :  { %v62_v40 = vmax.f32 %v60_v32, %v61_v37  ;;  %vm63_vm0 = vcmp.eq.f32.partialorder %v24_v0, %v41_v36  ;;  %vm64_vm1 = vcmp.eq.f32.partialorder %v25_v1, %v41_v36  ;;  %v141_v32 = vld [vmem:[%s836_s1] sm:$0xff]  ;;  %v319_v36 = vld [vmem:[%s839_s4 + $0x30] sm:$0xff]  ;;  %v142_v37 = vld [vmem:[%s836_s1 + $0x8] sm:$0xff] }
  0x11   :  { %vm65_vm2 = vcmp.eq.f32.partialorder %v26_v2, %v48_v38  ;;  %vm66_vm3 = vcmp.eq.f32.partialorder %v27_v3, %v48_v38  ;;  %vm67_vm4 = vcmp.eq.f32.partialorder %v28_v4, %v55_v39  ;;  %vm68_vm5 = vcmp.eq.f32.partialorder %v29_v5, %v55_v39  ;;  %v149_v38 = vld [vmem:[%s836_s1 + $0x40] sm:$0xff]  ;;  %v315_v39 = vld [vmem:[%s839_s4 + $0x10] sm:$0xff] }
  0x12   :  { %vm69_vm6 = vcmp.eq.f32.partialorder %v30_v7, %v62_v40  ;;  %vm70_vm7 = vcmp.eq.f32.partialorder %v31_v8, %v62_v40  ;;  %v71_v41 = vsel %vm63_vm0, %v33_v26, 16  ;;  %v72_v42 = vsel %vm64_vm1, %v34_v35, 16  ;;  %v316_v40 = vld [vmem:[%s839_s4 + $0x18] sm:$0xff] }
  0x13   :  { %v73_v43 = vsel %vm65_vm2, %v33_v26, 16  ;;  %v74_v44 = vsel %vm66_vm3, %v34_v35, 16  ;;  %v75_v45 = vsel %vm67_vm4, %v33_v26, 16  ;;  %v76_v46 = vsel %vm68_vm5, %v34_v35, 16  ;;  %188 = vperm.xlu2 %553, %v156_v24  }
  0x14   :  { %v77_v47 = vsel %vm69_vm6, %v33_v26, 16  ;;  %v78_v48 = vsel %vm70_vm7, %v34_v35, 16  ;;  %vm79_vm8 = vcmp.lt.s32.totalorder %v71_v41, %v72_v42  ;;  %vm90_vm9 = vcmp.lt.s32.totalorder %v73_v43, %v74_v44  ;;  %v153_v26 = vld [vmem:[%s837_s2 + $0x10] sm:$0xff]  ;;  %v318_v35 = vld [vmem:[%s839_s4 + $0x28] sm:$0xff] }
  0x15   :  { %v80_v49 = vsel %vm79_vm8, %v71_v41, %v72_v42  ;;  %v91_v50 = vsel %vm90_vm9, %v73_v43, %v74_v44  ;;  %vm101_vm10 = vcmp.lt.s32.totalorder %v75_v45, %v76_v46  ;;  %vm112_vm11 = vcmp.lt.s32.totalorder %v77_v47, %v78_v48  ;;  %v143_v41 = vld [vmem:[%s836_s1 + $0x10] sm:$0xff]  ;;  %v150_v42 = vld [vmem:[%s836_s1 + $0x48] sm:$0xff]  ;;  %v313_v43 = vld [vmem:[%s839_s4] sm:$0xff] }
  0x16   :  { %v81_v51 = vrot.slane %v80_v49, 4  ;;  %v92_v52 = vrot.slane %v91_v50, 4  ;;  %v102_v53 = vsel %vm101_vm10, %v75_v45, %v76_v46  ;;  %v113_v54 = vsel %vm112_vm11, %v77_v47, %v78_v48  ;;  %183 = vperm.xlu1 %552, %v155_v22   ;;  %v320_v44 = vld [vmem:[%s839_s4 + $0x38] sm:$0xff]  ;;  %v317_v46 = vld [vmem:[%s839_s4 + $0x20] sm:$0xff]  ;;  %v314_v48 = vld [vmem:[%s839_s4 + $0x8] sm:$0xff]  ;;  %s624_s4 = smov 8  }
  0x17   :  { %v103_v55 = vrot.slane %v102_v53, 4  ;;  %v114_v56 = vrot.slane %v113_v54, 4  ;;  %vm131_vm6 = vcmask 1041409   ;;  %vm133_vm7 = vcmask 1042434   ;;  %v144_v45 = vld [vmem:[%s836_s1 + $0x18] sm:$0xff]  ;;  %v145_v47 = vld [vmem:[%s836_s1 + $0x20] sm:$0xff] }
  0x18   :  { %vm82_vm12 = vcmp.lt.s32.totalorder %v80_v49, %v81_v51  ;;  %vm93_vm13 = vcmp.lt.s32.totalorder %v91_v50, %v92_v52  ;;  %vm135_vm10 = vcmask 1043459   ;;  %vm242_vm11 = vcmask 1043456  }
  0x19   :  { %v83_v57 = vsel %vm82_vm12, %v80_v49, %v81_v51  ;;  %v94_v58 = vsel %vm93_vm13, %v91_v50, %v92_v52  ;;  %vm104_vm14 = vcmp.lt.s32.totalorder %v102_v53, %v103_v55  ;;  %vm115_vm15 = vcmp.lt.s32.totalorder %v113_v54, %v114_v56  ;;  %v146_v49 = vld [vmem:[%s836_s1 + $0x28] sm:$0xff]  ;;  %v147_v50 = vld [vmem:[%s836_s1 + $0x30] sm:$0xff]  ;;  %s623_s1 = smov 128  }
  0x1a   :  { %v84_v59 = vrot.slane %v83_v57, 2  ;;  %v95_v60 = vrot.slane %v94_v58, 2  ;;  %v105_v61 = vsel %vm104_vm14, %v102_v53, %v103_v55  ;;  %v116_v62 = vsel %vm115_vm15, %v113_v54, %v114_v56 }
  0x1b   :  { %v106_v63 = vrot.slane %v105_v61, 2  ;;  %v117_v0 = vrot.slane %v116_v62, 2  ;;  %178 = vperm.xlu2 %553, %v154_v27   ;;  %vm211_vm12 = vcmask 31744   ;;  %vm373_vm13 = vcmask 654336   ;;  %v308_v27 = vld [vmem:[%s838_s3 + $0x28] sm:$0xff] }
  0x1c   :  { %vm85_vm0 = vcmp.lt.s32.totalorder %v83_v57, %v84_v59  ;;  %vm96_vm1 = vcmp.lt.s32.totalorder %v94_v58, %v95_v60 }
  0x1d   :  { %v86_v1 = vsel %vm85_vm0, %v83_v57, %v84_v59  ;;  %v97_v2 = vsel %vm96_vm1, %v94_v58, %v95_v60  ;;  %vm107_vm2 = vcmp.lt.s32.totalorder %v105_v61, %v106_v63  ;;  %vm118_vm3 = vcmp.lt.s32.totalorder %v116_v62, %v117_v0 }
  0x1e   :  { %v87_v3 = vrot.slane %v86_v1, 1  ;;  %v98_v4 = vrot.slane %v97_v2, 1  ;;  %v108_v5 = vsel %vm107_vm2, %v105_v61, %v106_v63  ;;  %v119_v6 = vsel %vm118_vm3, %v116_v62, %v117_v0  ;;  %168 = vperm.xlu1 %552, %v152_v25  }
  0x1f   :  { %v109_v7 = vrot.slane %v108_v5, 1  ;;  %v120_v8 = vrot.slane %v119_v6, 1 }
  0x20   :  { %vm88_vm4 = vcmp.lt.s32.totalorder %v86_v1, %v87_v3  ;;  %vm99_vm5 = vcmp.lt.s32.totalorder %v97_v2, %v98_v4 }
  0x21   :  { %v89_v9 = vsel %vm88_vm4, %v86_v1, %v87_v3  ;;  %v100_v10 = vsel %vm99_vm5, %v97_v2, %v98_v4  ;;  %vm110_vm8 = vcmp.lt.s32.totalorder %v108_v5, %v109_v7  ;;  %vm121_vm9 = vcmp.lt.s32.totalorder %v119_v6, %v120_v8 }
  0x22   :  { %v111_v11 = vsel %vm110_vm8, %v108_v5, %v109_v7  ;;  %v122_v12 = vsel %vm121_vm9, %v119_v6, %v120_v8  ;;  %v123_v13 = vcvt.s32.f32 %v89_v9  ;;  %v124_v14 = vcvt.s32.f32 %v100_v10 }
  0x23   :  { %v125_v15 = vcvt.s32.f32 %v111_v11  ;;  %v126_v16 = vcvt.s32.f32 %v122_v12  ;;  %163 = vperm.xlu2 %553, %v151_v34   ;;  %v311_v34 = vld [vmem:[%s838_s3 + $0x40] sm:$0xff] }
  0x24   :  { %v132_v17 = vsel %vm131_vm6, %v124_v14, %v123_v13 }
  0x25   :  { %v134_v18 = vsel %vm133_vm7, %v125_v15, %v132_v17 }
  0x26   :  { %v136_v19 = vsel %vm135_vm10, %v126_v16, %v134_v18  ;;  %365 = vperm.xlu1 %552, %v321_v28  }
  0x27   :  { %138 = vrot.lane.b32.xlu0 %v136_v19, %s621_s0 }
  0x2b   :  { %360 = vperm.xlu2 %553, %v320_v44  }
  0x2e   :  { %350 = vperm.xlu1 %552, %v318_v35   ;;  %v307_v35 = vld [vmem:[%s838_s3 + $0x20] sm:$0xff] }
  0x2f   :  { %208 = vperm.xlu0 %551, %v160_v23  }
  0x33   :  { %345 = vperm.xlu2 %553, %v317_v46  }
  0x36   :  { %335 = vperm.xlu1 %552, %v315_v39  }
  0x37   :  { %173 = vperm.xlu0 %551, %v153_v26   ;;  %v303_v26 = vld [vmem:[%s838_s3] sm:$0xff] }
  0x3b   :  { %330 = vperm.xlu2 %553, %v314_v48  }
  0x3f   :  { %370 = vperm.xlu0 %551, %v322_v29   ;;  %v304_v29 = vld [vmem:[%s838_s3 + $0x8] sm:$0xff] }
  0x47   :  { %355 = vperm.xlu0 %551, %v319_v36   ;;  %v312_v36 = vld [vmem:[%s838_s3 + $0x48] sm:$0xff] }
  0x4f   :  { %340 = vperm.xlu0 %551, %v316_v40  }
  0x57   :  { %325 = vperm.xlu0 %551, %v313_v43  }
  0x65   :  { %v194_v0 = vpop.permute.xlu2 %193 }
  0x6d   :  { %v189_v5 = vpop.permute.xlu2 %188 }
  0x75   :  { %v179_v8 = vpop.permute.xlu2 %178 }
  0x78   :  { %v204_v54 = vpop.permute.xlu1 %203 }
  0x7d   :  { %v164_v17 = vpop.permute.xlu2 %163 }
  0x80   :  { %v199_v58 = vpop.permute.xlu1 %198 }
  0x85   :  { %v361_v46 = vpop.permute.xlu2 %360 }
  0x88   :  { %v184_v7 = vpop.permute.xlu1 %183 }
  0x90   :  { %v169_v14 = vpop.permute.xlu1 %168 }
  0x98   :  { %v366_v44 = vpop.permute.xlu1 %365 }
  0x99   :  { %v139_v30 = vpop.permute.xlu0 %138 }
  0x9a   :  { %v140_v31 = vsub.f32 %v139_v30, %v136_v19  ;;  %v309_v30 = vld [vmem:[%s838_s3 + $0x30] sm:$0xff] }
  0x9c   :  { %512 = vmatpush.msk.msra.mxu0 %vm242_vm11, %v140_v31  ;;  %535 = vmatpush.msk.msra.mxu2 %vm242_vm11, %v140_v31  ;;  %v305_v31 = vld [vmem:[%s838_s3 + $0x10] sm:$0xff] }
  0x9d   :  { %513 = vmatmul.msk.f32.vlgmr.msra.gmra.mxu0 %vm211_vm12, %v141_v32  ;;  %520 = vmatmul.msk.f32.vlgmr.msra.gmra.mxu2 %vm211_vm12, %v148_v33  ;;  %v310_v32 = vld [vmem:[%s838_s3 + $0x38] sm:$0xff] }
  0x9e   :  { %v306_v33 = vld [vmem:[%s838_s3 + $0x18] sm:$0xff] }
  0xa1   :  { %v209_v59 = vpop.permute.xlu0 %208 }
  0xa5   :  { %514 = vmatmul.msk.f32.gmra.mxu0 %vm211_vm12, %v142_v37  ;;  %521 = vmatmul.msk.f32.gmra.mxu2 %vm211_vm12, %v149_v38 }
  0xa9   :  { %v174_v15 = vpop.permute.xlu0 %173 }
  0xad   :  { %515 = vmatmul.msk.f32.gmra.mxu0 %vm211_vm12, %v143_v41  ;;  %522 = vmatmul.msk.f32.gmra.mxu2 %vm211_vm12, %v150_v42 }
  0xb1   :  { %v371_v42 = vpop.permute.xlu0 %370 }
  0xb5   :  { %516 = vmatmul.msk.f32.gmra.mxu0 %vm211_vm12, %v144_v45 }
  0xbd   :  { %517 = vmatmul.msk.f32.gmra.mxu0 %vm211_vm12, %v145_v47  ;;  %v356_v47 = vpop.permute.xlu0 %355 }
  0xc5   :  { %518 = vmatmul.msk.f32.gmra.mxu0 %vm211_vm12, %v146_v49 }
  0xcd   :  { %519 = vmatmul.msk.f32.gmra.mxu0 %vm211_vm12, %v147_v50 }
 0x11a   :  { %v263_v51 = vpop.f32.mrf.mxu0 }
 0x11b   :  { %v264_v21 = vadd.f32 %v263_v51, %v164_v17 }
 0x120   :  { %v284_v52 = vpop.f32.mrf.mxu2 }
 0x121   :  { %v285_v61 = vadd.f32 %v284_v52, %v199_v58  ;;  %v351_v52 = vpop.permute.xlu1 %350 }
 0x122   :  { %v266_v53 = vpop.f32.mrf.mxu0 }
 0x123   :  { %v267_v19 = vadd.f32 %v266_v53, %v169_v14  ;;  %v462_v14 = vld [vmem:[%s840_s5 + $0x8] sm:$0xff] }
 0x128   :  { %v287_v55 = vpop.f32.mrf.mxu2 }
 0x129   :  { %v288_v57 = vadd.f32 %v287_v55, %v204_v54  ;;  %v346_v54 = vpop.permute.xlu2 %345 }
 0x12a   :  { %v269_v56 = vpop.f32.mrf.mxu0 }
 0x12b   :  { %554 = vtanh.f32 %v288_v57  ;;  %v270_v16 = vadd.f32 %v269_v56, %v174_v15  ;;  %v341_v56 = vpop.permute.xlu0 %340 }
 0x130   :  { %v290_v60 = vpop.f32.mrf.mxu2 }
 0x131   :  { %v291_v62 = vadd.f32 %v290_v60, %v209_v59  ;;  %v555_v1 = vpop.eup %554 }
 0x132   :  { %v272_v63 = vpop.f32.mrf.mxu0 }
 0x133   :  { %556 = vtanh.f32 %v291_v62  ;;  %v273_v13 = vadd.f32 %v272_v63, %v179_v8  ;;  %v336_v63 = vpop.permute.xlu1 %335 }
 0x134   :  { %558 = vtanh.f32 %v285_v61 }
 0x139   :  { %v557_v2 = vpop.eup %556 }
 0x13a   :  { %v275_v3 = vpop.f32.mrf.mxu0  ;;  %410 = vmatpush.msra.mxu1 %v557_v2  ;;  %536 = vmatpush.msra.mxu3 %v557_v2  ;;  %v559_v4 = vpop.eup %558 }
 0x13b   :  { %v276_v12 = vadd.f32 %v275_v3, %v184_v7  ;;  %v331_v2 = vpop.permute.xlu2 %330 }
 0x13c   :  { %411 = vmatpush.msra.mxu1 %v555_v1  ;;  %537 = vmatpush.msra.mxu3 %v555_v1 }
 0x13e   :  { %412 = vmatpush.msra.mxu1 %v559_v4  ;;  %538 = vmatpush.msra.mxu3 %v559_v4 }
 0x142   :  { %v278_v6 = vpop.f32.mrf.mxu0 }
 0x143   :  { %v279_v10 = vadd.f32 %v278_v6, %v189_v5  ;;  %v326_v5 = vpop.permute.xlu0 %325 }
 0x14a   :  { %v281_v9 = vpop.f32.mrf.mxu0 }
 0x14b   :  { %v282_v11 = vadd.f32 %v281_v9, %v194_v0 }
 0x14d   :  { %560 = vtanh.f32 %v282_v11 }
 0x14e   :  { %562 = vtanh.f32 %v279_v10 }
 0x14f   :  { %564 = vtanh.f32 %v276_v12  ;;  %v461_v12 = vld [vmem:[%s840_s5] sm:$0xff] }
 0x150   :  { %566 = vtanh.f32 %v273_v13 }
 0x151   :  { %568 = vtanh.f32 %v270_v16 }
 0x152   :  { %570 = vtanh.f32 %v267_v19 }
 0x153   :  { %v561_v18 = vpop.eup %560  ;;  %572 = vtanh.f32 %v264_v21 }
 0x154   :  { %413 = vmatpush.msra.mxu1 %v561_v18  ;;  %539 = vmatpush.msra.mxu3 %v561_v18  ;;  %v563_v20 = vpop.eup %562 }
 0x155   :  { %v565_v22 = vpop.eup %564 }
 0x156   :  { %414 = vmatpush.msra.mxu1 %v563_v20  ;;  %540 = vmatpush.msra.mxu3 %v563_v20  ;;  %v567_v23 = vpop.eup %566 }
 0x157   :  { %v569_v24 = vpop.eup %568 }
 0x158   :  { %415 = vmatpush.msra.mxu1 %v565_v22  ;;  %541 = vmatpush.msra.mxu3 %v565_v22  ;;  %v571_v25 = vpop.eup %570 }
 0x159   :  { %v573_v28 = vpop.eup %572 }
 0x15a   :  { %416 = vmatpush.msra.mxu1 %v567_v23  ;;  %542 = vmatpush.msra.mxu3 %v567_v23 }
 0x15c   :  { %417 = vmatpush.msra.mxu1 %v569_v24  ;;  %543 = vmatpush.msra.mxu3 %v569_v24 }
 0x15e   :  { %418 = vmatpush.msra.mxu1 %v571_v25  ;;  %544 = vmatpush.msra.mxu3 %v571_v25 }
 0x160   :  { %419 = vmatpush.msra.mxu1 %v573_v28  ;;  %545 = vmatpush.msra.mxu3 %v573_v28 }
 0x161   :  { %523 = vmatmul.msk.f32.vlgmr.msra.gmra.mxu1 %vm373_vm13, %v303_v26  ;;  %528 = vmatmul.msk.f32.vlgmr.msra.gmra.mxu3 %vm373_vm13, %v308_v27 }
 0x169   :  { %524 = vmatmul.msk.f32.gmra.mxu1 %vm373_vm13, %v304_v29  ;;  %529 = vmatmul.msk.f32.gmra.mxu3 %vm373_vm13, %v309_v30 }
 0x171   :  { %525 = vmatmul.msk.f32.gmra.mxu1 %vm373_vm13, %v305_v31  ;;  %530 = vmatmul.msk.f32.gmra.mxu3 %vm373_vm13, %v310_v32 }
 0x179   :  { %526 = vmatmul.msk.f32.gmra.mxu1 %vm373_vm13, %v306_v33  ;;  %531 = vmatmul.msk.f32.gmra.mxu3 %vm373_vm13, %v311_v34 }
 0x181   :  { %527 = vmatmul.msk.f32.gmra.mxu1 %vm373_vm13, %v307_v35  ;;  %532 = vmatmul.msk.f32.gmra.mxu3 %vm373_vm13, %v312_v36 }
 0x1de   :  { %v421_v37 = vpop.f32.mrf.mxu1 }
 0x1df   :  { %v422_v7 = vadd.f32 %v421_v37, %v326_v5 }
 0x1e4   :  { %v436_v38 = vpop.f32.mrf.mxu3 }
 0x1e5   :  { %v437_v58 = vadd.f32 %v436_v38, %v351_v52 }
 0x1e6   :  { %v424_v39 = vpop.f32.mrf.mxu1 }
 0x1e7   :  { %v425_v4 = vadd.f32 %v424_v39, %v331_v2 }
 0x1ec   :  { %v439_v40 = vpop.f32.mrf.mxu3 }
 0x1ed   :  { %v440_v55 = vadd.f32 %v439_v40, %v356_v47 }
 0x1ee   :  { %v427_v43 = vpop.f32.mrf.mxu1 }
 0x1ef   :  { %v428_v1 = vadd.f32 %v427_v43, %v336_v63 }
 0x1f4   :  { %v442_v41 = vpop.f32.mrf.mxu3 }
 0x1f5   :  { %v443_v53 = vadd.f32 %v442_v41, %v361_v46 }
 0x1f6   :  { %v430_v48 = vpop.f32.mrf.mxu1 }
 0x1f7   :  { %v431_v62 = vadd.f32 %v430_v48, %v341_v56 }
 0x1fc   :  { %v445_v45 = vpop.f32.mrf.mxu3 }
 0x1fd   :  { %v446_v50 = vadd.f32 %v445_v45, %v366_v44 }
 0x1fe   :  { %v433_v57 = vpop.f32.mrf.mxu1 }
 0x1ff   :  { %v434_v60 = vadd.f32 %v433_v57, %v346_v54 }
 0x204   :  { %v448_v49 = vpop.f32.mrf.mxu3 }
 0x205   :  { %v449_v51 = vadd.f32 %v448_v49, %v371_v42 }
 0x207   :  { %574 = vtanh.f32 %v449_v51 }
 0x208   :  { %576 = vtanh.f32 %v446_v50 }
 0x209   :  { %578 = vtanh.f32 %v443_v53 }
 0x20a   :  { %580 = vtanh.f32 %v440_v55 }
 0x20b   :  { %582 = vtanh.f32 %v437_v58 }
 0x20c   :  { %584 = vtanh.f32 %v434_v60 }
 0x20d   :  { %v575_v59 = vpop.eup %574  ;;  %586 = vtanh.f32 %v431_v62 }
 0x20e   :  { %475 = vmatpush.msrb.mxu2 %v575_v59  ;;  %v577_v61 = vpop.eup %576  ;;  %588 = vtanh.f32 %v428_v1 }
 0x20f   :  { %v579_v0 = vpop.eup %578  ;;  %590 = vtanh.f32 %v425_v4 }
 0x210   :  { %476 = vmatpush.msrb.mxu2 %v577_v61  ;;  %v581_v3 = vpop.eup %580  ;;  %592 = vtanh.f32 %v422_v7 }
 0x211   :  { %v583_v6 = vpop.eup %582 }
 0x212   :  { %477 = vmatpush.msrb.mxu2 %v579_v0  ;;  %v585_v8 = vpop.eup %584 }
 0x213   :  { %v587_v9 = vpop.eup %586 }
 0x214   :  { %478 = vmatpush.msrb.mxu2 %v581_v3  ;;  %v589_v10 = vpop.eup %588 }
 0x215   :  { %v591_v11 = vpop.eup %590 }
 0x216   :  { %479 = vmatpush.msrb.mxu2 %v583_v6  ;;  %v593_v13 = vpop.eup %592 }
 0x218   :  { %480 = vmatpush.msrb.mxu2 %v585_v8 }
 0x21a   :  { %481 = vmatpush.msrb.mxu2 %v587_v9 }
 0x21c   :  { %482 = vmatpush.msrb.mxu2 %v589_v10 }
 0x21e   :  { %483 = vmatpush.msrb.mxu2 %v591_v11 }
 0x220   :  { %484 = vmatpush.msrb.mxu2 %v593_v13 }
 0x221   :  { %533 = vmatmul.msk.f32.vlgmr.msrb.gmra.mxu2 %vm373_vm13, %v461_v12 }
 0x229   :  { %534 = vmatmul.msk.f32.gmra.mxu2 %vm373_vm13, %v462_v14 }
 0x2a4   :  { %v486_v15 = vpop.f32.mrf.mxu2 }
 0x2a5   :  { %492 = vst [vmem:[#allocation2] sm:$0xff] %v486_v15 }
 0x2ac   :  { %v489_v16 = vpop.f32.mrf.mxu2 }
 0x2ad   :  { %493 = vst [vmem:[#allocation2 + $0x8] sm:$0xff] %v489_v16 }
 0x2ae   :  { %506 = dma.vmem_to_hbm [thread:$0]  %s499_s18, 256, %s501_s21, [#allocation3], %s623_s1, %s623_s1, %s624_s4  }
 0x2af   :  { %618 = dma.done.wait [#allocation3], 256  }
 0x2b0   :  { %619 = vsyncadd [#allocation3], 4294967040 }
 0x2b1   :  { %511 = vsyncpa [#allocation3], 1 }

</bundles_post_ra>
